<compile_context>
chip_gen: v7x
topology: tpu7x:2x2x1
jax: 0.10.0
libtpu: 0.0.40
codegen_flags: <defaults>
</compile_context>

<pallas_src>
import functools

import jax
import jax.numpy as jnp
import numpy as np
from jax.experimental import pallas as pl
from jax.experimental.pallas import tpu as pltpu


def _round_up(x, m):
    return ((x + m - 1) // m) * m


# ------------------------------- fused kernel -------------------------------

def _make_vqa_kernel(Bt):
    """Visual encode + pool (accumulated across the patch grid axis), text
    encode + pool, concat-free classifier head (runs on the last patch step)."""

    def kernel(img_ref, txt_ref, wv_ref, w1i_ref, w1t_ref, b1_ref, w2_ref, b2_ref,
               o_ref, acc_ref):
        pi = pl.program_id(1)                       # patch-tile (reduction) axis

        @pl.when(pi == 0)
        def _init():
            acc_ref[...] = jnp.zeros_like(acc_ref)

        # ---- visual branch: GELU(patch_rows @ wv), accumulate the pooled sum ---
        # img_ref: [Bt, Npt, Kpad] bf16; wv_ref: [Kpad, Dv] bf16 (bv folded into
        # the "ones-column" row of wv).  Batched MXU matmul, f32 accumulation.
        wv_b = jnp.broadcast_to(wv_ref[...], (Bt,) + tuple(wv_ref.shape))
        h_img = jnp.einsum("bnk,bkd->bnd", img_ref[...], wv_b,
                           preferred_element_type=jnp.float32)       # [Bt,Npt,Dv]
        h_img = jax.nn.gelu(h_img, approximate=True)                  # f32 (v5e-safe)
        acc_ref[...] += h_img.sum(axis=1)                             # [Bt,Dv] f32
        # TODO(synk): on v6e/v7x keep the GELU in bf16 (bf16 VPU/EUP) and only the
        # pooled accumulator in f32; f32 elementwise is kept here for v5e safety.

        # ---- classifier head: run once, on the last patch step -----------------
        @pl.when(pi == pl.num_programs(1) - 1)
        def _head():
            # text branch: projection *and* bias pre-folded into the bf16 token
            # table, so it is just GELU + sum-pool (1/S mean folded into w1t).
            h_txt = jax.nn.gelu(txt_ref[...].astype(jnp.float32), approximate=True)
            txt_feat = h_txt.sum(axis=1)                              # [Bt,Dt] f32
            # cat((image, text)) @ w1  ==  img @ w1_img + txt @ w1_txt
            h = (jnp.dot(acc_ref[...].astype(jnp.bfloat16), w1i_ref[...],
                         preferred_element_type=jnp.float32)
                 + jnp.dot(txt_feat.astype(jnp.bfloat16), w1t_ref[...],
                           preferred_element_type=jnp.float32)
                 + b1_ref[...])
            h = jnp.maximum(h, 0.0)                                   # ReLU, f32
            o_ref[...] = jnp.dot(h.astype(jnp.bfloat16), w2_ref[...],
                                 preferred_element_type=jnp.float32) + b2_ref[...]

    return kernel


# ------------------------------- glue ---------------------------------------

def extract_patches(image, P):
    # image: [B, C, H, W] (NCHW) -> [B, N_patches, C*P*P]
    # TODO(synk): at real ViT sizes, express this gather via the BlockSpec
    # index_map over an NHWC-friendly layout instead of a materialized transpose;
    # inside the jit below XLA at least fuses it with the pad/cast slab write.
    B, C, H, W = image.shape
    nh, nw = H // P, W // P
    x = image.reshape(B, C, nh, P, nw, P)
    x = x.transpose(0, 2, 4, 1, 3, 5)          # [B, nh, nw, C, P, P]
    return x.reshape(B, nh * nw, C * P * P)


def init_params(key, *, C, P, E, vocab, Dv, Dt, hidden, num_answers):
    k = jax.random.split(key, 8)
    Kimg = C * P * P
    return {
        # visual encoder (ViT patch-embed style)
        "wv": jax.random.normal(k[0], (Kimg, Dv), jnp.float32) * 0.02,
        "bv": jnp.zeros((1, Dv), jnp.float32),
        # text encoder (RoBERTa-ish: embedding + projection)
        "tok_emb": jax.random.normal(k[1], (vocab, E), jnp.float32) * 0.02,
        "wt": jax.random.normal(k[2], (E, Dt), jnp.float32) * 0.02,
        "bt": jnp.zeros((1, Dt), jnp.float32),
        # classifier head
        "w1": jax.random.normal(k[3], (Dv + Dt, hidden), jnp.float32) * 0.02,
        "b1": jnp.zeros((1, hidden), jnp.float32),
        "w2": jax.random.normal(k[4], (hidden, num_answers), jnp.float32) * 0.02,
        "b2": jnp.zeros((1, num_answers), jnp.float32),
    }


def prepare_kernel_params(params, *, Np, S, lane=128, k_align=256):
    """One-time transform of canonical params into kernel-ready (bf16, split,
    bias-folded, mean-folded, lane/MXU-padded) form."""
    Kimg, Dv = params["wv"].shape
    Dt = params["wt"].shape[1]
    hidden, A = params["w2"].shape
    Kpad = _round_up(Kimg + 1, k_align)     # +1 row carries the folded bv
    Apad = _round_up(A, lane)               # lane-dense output stores

    # Fold bv into the extra "ones-column" row of wv (image rows get a 1.0 there).
    wv = jnp.zeros((Kpad, Dv), jnp.float32)
    wv = wv.at[:Kimg].set(params["wv"]).at[Kimg].set(params["bv"][0])
    wv = wv.astype(jnp.bfloat16)
    # Fold the token projection AND its bias into the embedding table, bf16.
    proj_tok = (params["tok_emb"] @ params["wt"] + params["bt"]).astype(jnp.bfloat16)
    # Split w1 (concat order = (image, text)) and fold in the 1/N mean factors.
    w1i = (params["w1"][:Dv, :] / float(Np)).astype(jnp.bfloat16)
    w1t = (params["w1"][Dv:, :] / float(S)).astype(jnp.bfloat16)
    w2 = jnp.pad(params["w2"], ((0, 0), (0, Apad - A))).astype(jnp.bfloat16)
    b2 = jnp.pad(params["b2"], ((0, 0), (0, Apad - A)))

    kparams = {"wv": wv, "proj_tok": proj_tok, "w1i": w1i, "w1t": w1t,
               "b1": params["b1"], "w2": w2, "b2": b2}
    cfg = {"Kimg": Kimg, "Kpad": Kpad, "Apad": Apad, "num_answers": A}
    return kparams, cfg


@functools.partial(jax.jit, static_argnames=("P", "num_answers"))
def vqa_forward(kparams, image, answer, *, P, num_answers):
    B = image.shape[0]
    Kpad, Dv = kparams["wv"].shape
    Dt = kparams["proj_tok"].shape[1]
    hidden, Apad = kparams["w2"].shape

    # visual slab: patches + ones-column (activates the folded bv row) + zero pad.
    patches = extract_patches(image, P)                            # [B, Np, Kimg]
    Np, Kimg = patches.shape[1], patches.shape[2]
    img_blk = jnp.concatenate(
        [patches,
         jnp.ones((B, Np, 1), patches.dtype),                     # folded-bias column
         jnp.zeros((B, Np, Kpad - Kimg - 1), patches.dtype)],     # inert zero padding
        axis=-1).astype(jnp.bfloat16)                              # [B, Np, Kpad] bf16
    # NOTE: if Np is ever zero-padded to a sublane multiple, padded patch rows must
    # keep the ones-column at 0.0 so they contribute exactly zero to the pooled sum.

    # text slab: gather of the pre-projected, bias-folded bf16 token table.
    S = answer.shape[1]
    txt_blk = kparams["proj_tok"][answer]                          # [B, S, Dt] bf16

    # Tiling: whole batch / whole patch set per grid step at these toy shapes.
    # TODO(synk): at real ViT/RoBERTa sizes pick Bt (multiple of 8, ideally >=128
    # rows into the head dots) and Npt (multiple of 8; halve on v7x's 64 MiB VMEM)
    # so double-buffered img tiles + resident weights fit vmem_limit_bytes.
    Bt, Npt = B, Np
    grid = (B // Bt, Np // Npt)

    flops = (2 * B * Np * Kpad * Dv + 2 * B * (Dv + Dt) * hidden
             + 2 * B * hidden * Apad)
    transcendentals = B * Np * Dv + B * S * Dt
    bytes_accessed = (img_blk.size * 2 + txt_blk.size * 2
                      + Kpad * Dv * 2 + (Dv + Dt) * hidden * 2 + hidden * Apad * 2
                      + (hidden + Apad) * 4 + B * Apad * 4)

    out = pl.pallas_call(
        _make_vqa_kernel(Bt),
        out_shape=jax.ShapeDtypeStruct((B, Apad), jnp.float32),
        grid_spec=pltpu.PrefetchScalarGridSpec(
            num_scalar_prefetch=0,
            grid=grid,
            in_specs=[
                pl.BlockSpec((Bt, Npt, Kpad), lambda bi, pi: (bi, pi, 0)),  # img
                pl.BlockSpec((Bt, S, Dt), lambda bi, pi: (bi, 0, 0)),       # txt
                # weights / biases: constant block index -> resident in VMEM.
                # TODO(synk): consider pipeline_mode=pl.Buffered(1) for these to
                # avoid double-buffering invariant operands within v7x's budget.
                pl.BlockSpec((Kpad, Dv), lambda bi, pi: (0, 0)),            # wv
                pl.BlockSpec((Dv, hidden), lambda bi, pi: (0, 0)),          # w1i
                pl.BlockSpec((Dt, hidden), lambda bi, pi: (0, 0)),          # w1t
                pl.BlockSpec((1, hidden), lambda bi, pi: (0, 0)),           # b1
                pl.BlockSpec((hidden, Apad), lambda bi, pi: (0, 0)),        # w2
                pl.BlockSpec((1, Apad), lambda bi, pi: (0, 0)),             # b2
            ],
            out_specs=pl.BlockSpec((Bt, Apad), lambda bi, pi: (bi, 0)),
            scratch_shapes=[pltpu.VMEM((Bt, Dv), jnp.float32)],             # pooled acc
        ),
        compiler_params=pltpu.CompilerParams(
            dimension_semantics=("parallel", "arbitrary"),   # batch || , patch reduce
            vmem_limit_bytes=32 * 1024 * 1024),
        cost_estimate=pl.CostEstimate(flops=flops,
                                      transcendentals=transcendentals,
                                      bytes_accessed=bytes_accessed),
    )(img_blk, txt_blk,
      kparams["wv"], kparams["w1i"], kparams["w1t"], kparams["b1"],
      kparams["w2"], kparams["b2"])
    return out[:, :num_answers]                                    # [B, num_answers]


def vqa_forward_ref(params, image, answer, *, P):
    # Pure-JAX f32 reference (canonical params: mean-pool, concat, fused w1).
    emb = params["tok_emb"][answer]
    t = jax.nn.gelu(jnp.einsum("bse,ed->bsd", emb, params["wt"]) + params["bt"][None],
                    approximate=True).mean(axis=1)
    patches = extract_patches(image, P)
    v = jax.nn.gelu(jnp.einsum("bnk,kd->bnd", patches, params["wv"]) + params["bv"][None],
                    approximate=True).mean(axis=1)
    x = jnp.concatenate([v, t], axis=1)
    h = jnp.maximum(x @ params["w1"] + params["b1"], 0.0)
    return h @ params["w2"] + params["b2"]


# ------------------------------- main ---------------------------------------

if __name__ == "__main__":
    B, C, H, W = 2, 3, 16, 16
    P = 8                      # patch size -> N_patches = 4, K_img = C*P*P = 192
    S, vocab, E = 8, 50, 16    # answer sequence length, vocab, token embed dim
    Dv, Dt = 128, 128          # pooled visual / text feature dims (lane-dense)
    hidden, num_answers = 128, 10

    key = jax.random.PRNGKey(0)
    k_img, k_ans, k_par = jax.random.split(key, 3)

    image = jax.random.normal(k_img, (B, C, H, W), jnp.float32)    # NCHW, like PyTorch
    answer = jax.random.randint(k_ans, (B, S), 0, vocab, jnp.int32)
    params = init_params(k_par, C=C, P=P, E=E, vocab=vocab,
                         Dv=Dv, Dt=Dt, hidden=hidden, num_answers=num_answers)

    Np = (H // P) * (W // P)
    kparams, cfg = prepare_kernel_params(params, Np=Np, S=S)

    logits = jax.block_until_ready(
        vqa_forward(kparams, image, answer, P=P, num_answers=cfg["num_answers"]))
    ref = jax.block_until_ready(vqa_forward_ref(params, image, answer, P=P))

    assert logits.shape == (B, num_answers), logits.shape
    # bf16 MXU inputs / bf16 token table (f32 accumulation) => loosened tolerance.
    np.testing.assert_allclose(np.asarray(logits), np.asarray(ref),
                               rtol=5e-2, atol=5e-3)
    print("KERNEL_OK")
</pallas_src>

<mosaic_0001>
module attributes {stable_mosaic.version = 11 : i64} {
  func.func @kernel(%arg0: i32, %arg1: i32, %arg2: memref<2x4x256xbf16, #tpu.memory_space<vmem>>, %arg3: memref<2x8x128xbf16, #tpu.memory_space<vmem>>, %arg4: memref<256x128xbf16, #tpu.memory_space<vmem>>, %arg5: memref<128x128xbf16, #tpu.memory_space<vmem>>, %arg6: memref<128x128xbf16, #tpu.memory_space<vmem>>, %arg7: memref<1x128xf32, #tpu.memory_space<vmem>>, %arg8: memref<128x128xbf16, #tpu.memory_space<vmem>>, %arg9: memref<1x128xf32, #tpu.memory_space<vmem>>, %arg10: memref<2x128xf32, #tpu.memory_space<vmem>>, %arg11: memref<2x128xf32, #tpu.memory_space<vmem>>) attributes {dimension_semantics = [#tpu.dimension_semantics<parallel>, #tpu.dimension_semantics<arbitrary>], iteration_bounds = array<i64: 1, 1>, scalar_prefetch = 0 : i64, scratch_operands = 1 : i64, tpu.core_type = #tpu.core_type<tc>, window_params = [{transform_indices = @transform_0, window_bounds = array<i64: 2, 4, 256>}, {transform_indices = @transform_1, window_bounds = array<i64: 2, 8, 128>}, {pipeline_mode = #tpu.pipeline_mode<synchronous>, transform_indices = @transform_2, window_bounds = array<i64: 256, 128>}, {pipeline_mode = #tpu.pipeline_mode<synchronous>, transform_indices = @transform_3, window_bounds = array<i64: 128, 128>}, {pipeline_mode = #tpu.pipeline_mode<synchronous>, transform_indices = @transform_4, window_bounds = array<i64: 128, 128>}, {pipeline_mode = #tpu.pipeline_mode<synchronous>, transform_indices = @transform_5, window_bounds = array<i64: 1, 128>}, {pipeline_mode = #tpu.pipeline_mode<synchronous>, transform_indices = @transform_6, window_bounds = array<i64: 128, 128>}, {pipeline_mode = #tpu.pipeline_mode<synchronous>, transform_indices = @transform_7, window_bounds = array<i64: 1, 128>}, {transform_indices = @transform_8, window_bounds = array<i64: 2, 128>}]} {
    %c0_i32 = arith.constant 0 : i32
    %0 = arith.cmpi eq, %arg1, %c0_i32 : i32
    %1 = arith.extui %0 : i1 to i32
    %c0_i32_0 = arith.constant 0 : i32
    %2 = arith.cmpi ne, %1, %c0_i32_0 : i32
    scf.if %2 {
      %cst_16 = arith.constant 0.000000e+00 : f32
      %28 = vector.broadcast %cst_16 : f32 to vector<2x128xf32>
      %c0_17 = arith.constant 0 : index
      %c0_18 = arith.constant 0 : index
      %29 = vector.load %arg11[%c0_17, %c0_18] : memref<2x128xf32, #tpu.memory_space<vmem>>, vector<2x128xf32>
      tpu.vector_store %arg11[%c0_17, %c0_18], %28 {strides = array<i32>} : memref<2x128xf32, #tpu.memory_space<vmem>>, vector<2x128xf32>,
    } else {
    }
    %c0 = arith.constant 0 : index
    %c0_1 = arith.constant 0 : index
    %3 = vector.load %arg4[%c0, %c0_1] : memref<256x128xbf16, #tpu.memory_space<vmem>>, vector<256x128xbf16>
    %4 = vector.shape_cast %3 : vector<256x128xbf16> to vector<1x256x128xbf16>
    %5 = vector.broadcast %4 : vector<1x256x128xbf16> to vector<2x256x128xbf16>
    %c0_2 = arith.constant 0 : index
    %c0_3 = arith.constant 0 : index
    %c0_4 = arith.constant 0 : index
    %6 = vector.load %arg2[%c0_2, %c0_3, %c0_4] : memref<2x4x256xbf16, #tpu.memory_space<vmem>>, vector<2x4x256xbf16>
    "tpu.trace_start"() <{level = 10 : i32, message = "bnk,bkd->bnd"}> : () -> ()
    %cst = arith.constant dense<0.000000e+00> : vector<2x4x128xf32>
    %7 = tpu.matmul %6, %5, %cst {dimension_numbers = #tpu.dot_dimension_numbers<[2], [1], [1], [2], [0, 0, 0, 1, 1, 2], [0], [0]>} : vector<2x4x256xbf16>, vector<2x256x128xbf16>, vector<2x4x128xf32> -> vector<2x4x128xf32>
    "tpu.trace_stop"() : () -> ()
    %8 = arith.mulf %7, %7 : vector<2x4x128xf32>
    %9 = arith.mulf %7, %8 : vector<2x4x128xf32>
    %cst_5 = arith.constant 4.471500e-02 : f32
    %10 = vector.broadcast %cst_5 : f32 to vector<2x4x128xf32>
    %11 = arith.mulf %10, %9 : vector<2x4x128xf32>
    %12 = arith.addf %7, %11 : vector<2x4x128xf32>
    %cst_6 = arith.constant 0.797884583 : f32
    %13 = vector.broadcast %cst_6 : f32 to vector<2x4x128xf32>
    %14 = arith.mulf %13, %12 : vector<2x4x128xf32>
    %15 = math.tanh %14 : vector<2x4x128xf32>
    %cst_7 = arith.constant 1.000000e+00 : f32
    %16 = vector.broadcast %cst_7 : f32 to vector<2x4x128xf32>
    %17 = arith.addf %16, %15 : vector<2x4x128xf32>
    %cst_8 = arith.constant 5.000000e-01 : f32
    %18 = vector.broadcast %cst_8 : f32 to vector<2x4x128xf32>
    %19 = arith.mulf %18, %17 : vector<2x4x128xf32>
    %20 = arith.mulf %7, %19 : vector<2x4x128xf32>
    %c0_9 = arith.constant 0 : index
    %c0_10 = arith.constant 0 : index
    %21 = vector.load %arg11[%c0_9, %c0_10] : memref<2x128xf32, #tpu.memory_space<vmem>>, vector<2x128xf32>
    %cst_11 = arith.constant dense<0.000000e+00> : vector<2x128xf32>
    %22 = vector.multi_reduction <add>, %20, %cst_11 [1] : vector<2x4x128xf32> to vector<2x128xf32>
    %23 = arith.addf %21, %22 : vector<2x128xf32>
    %c0_12 = arith.constant 0 : index
    %c0_13 = arith.constant 0 : index
    %24 = vector.load %arg11[%c0_12, %c0_13] : memref<2x128xf32, #tpu.memory_space<vmem>>, vector<2x128xf32>
    tpu.vector_store %arg11[%c0_12, %c0_13], %23 {strides = array<i32>} : memref<2x128xf32, #tpu.memory_space<vmem>>, vector<2x128xf32>,
    %c0_i32_14 = arith.constant 0 : i32
    %25 = arith.cmpi eq, %arg1, %c0_i32_14 : i32
    %26 = arith.extui %25 : i1 to i32
    %c0_i32_15 = arith.constant 0 : i32
    %27 = arith.cmpi ne, %26, %c0_i32_15 : i32
    scf.if %27 {
      %c0_16 = arith.constant 0 : index
      %c0_17 = arith.constant 0 : index
      %c0_18 = arith.constant 0 : index
      %28 = vector.load %arg3[%c0_16, %c0_17, %c0_18] : memref<2x8x128xbf16, #tpu.memory_space<vmem>>, vector<2x8x128xbf16>
      %29 = arith.extf %28 : vector<2x8x128xbf16> to vector<2x8x128xf32>
      %30 = arith.mulf %29, %29 : vector<2x8x128xf32>
      %31 = arith.mulf %29, %30 : vector<2x8x128xf32>
      %cst_19 = arith.constant 4.471500e-02 : f32
      %32 = vector.broadcast %cst_19 : f32 to vector<2x8x128xf32>
      %33 = arith.mulf %32, %31 : vector<2x8x128xf32>
      %34 = arith.addf %29, %33 : vector<2x8x128xf32>
      %cst_20 = arith.constant 0.797884583 : f32
      %35 = vector.broadcast %cst_20 : f32 to vector<2x8x128xf32>
      %36 = arith.mulf %35, %34 : vector<2x8x128xf32>
      %37 = math.tanh %36 : vector<2x8x128xf32>
      %cst_21 = arith.constant 1.000000e+00 : f32
      %38 = vector.broadcast %cst_21 : f32 to vector<2x8x128xf32>
      %39 = arith.addf %38, %37 : vector<2x8x128xf32>
      %cst_22 = arith.constant 5.000000e-01 : f32
      %40 = vector.broadcast %cst_22 : f32 to vector<2x8x128xf32>
      %41 = arith.mulf %40, %39 : vector<2x8x128xf32>
      %42 = arith.mulf %29, %41 : vector<2x8x128xf32>
      %cst_23 = arith.constant dense<0.000000e+00> : vector<2x128xf32>
      %43 = vector.multi_reduction <add>, %42, %cst_23 [1] : vector<2x8x128xf32> to vector<2x128xf32>
      %c0_24 = arith.constant 0 : index
      %c0_25 = arith.constant 0 : index
      %44 = vector.load %arg11[%c0_24, %c0_25] : memref<2x128xf32, #tpu.memory_space<vmem>>, vector<2x128xf32>
      %45 = arith.truncf %44 : vector<2x128xf32> to vector<2x128xbf16>
      %c0_26 = arith.constant 0 : index
      %c0_27 = arith.constant 0 : index
      %46 = vector.load %arg5[%c0_26, %c0_27] : memref<128x128xbf16, #tpu.memory_space<vmem>>, vector<128x128xbf16>
      %cst_28 = arith.constant dense<0.000000e+00> : vector<2x128xf32>
      %47 = tpu.matmul %45, %46, %cst_28 {dimension_numbers = #tpu.dot_dimension_numbers<[1], [0], [0], [1], [0, 0, 1, 1], [], []>} : vector<2x128xbf16>, vector<128x128xbf16>, vector<2x128xf32> -> vector<2x128xf32>
      %48 = arith.truncf %43 : vector<2x128xf32> to vector<2x128xbf16>
      %c0_29 = arith.constant 0 : index
      %c0_30 = arith.constant 0 : index
      %49 = vector.load %arg6[%c0_29, %c0_30] : memref<128x128xbf16, #tpu.memory_space<vmem>>, vector<128x128xbf16>
      %cst_31 = arith.constant dense<0.000000e+00> : vector<2x128xf32>
      %50 = tpu.matmul %48, %49, %cst_31 {dimension_numbers = #tpu.dot_dimension_numbers<[1], [0], [0], [1], [0, 0, 1, 1], [], []>} : vector<2x128xbf16>, vector<128x128xbf16>, vector<2x128xf32> -> vector<2x128xf32>
      %51 = arith.addf %47, %50 : vector<2x128xf32>
      %c0_32 = arith.constant 0 : index
      %c0_33 = arith.constant 0 : index
      %52 = vector.load %arg7[%c0_32, %c0_33] : memref<1x128xf32, #tpu.memory_space<vmem>>, vector<1x128xf32>
      %53 = vector.broadcast %52 : vector<1x128xf32> to vector<2x128xf32>
      %54 = arith.addf %51, %53 : vector<2x128xf32>
      %cst_34 = arith.constant 0.000000e+00 : f32
      %55 = vector.broadcast %cst_34 : f32 to vector<2x128xf32>
      %56 = arith.maximumf %54, %55 : vector<2x128xf32>
      %57 = arith.truncf %56 : vector<2x128xf32> to vector<2x128xbf16>
      %c0_35 = arith.constant 0 : index
      %c0_36 = arith.constant 0 : index
      %58 = vector.load %arg8[%c0_35, %c0_36] : memref<128x128xbf16, #tpu.memory_space<vmem>>, vector<128x128xbf16>
      %cst_37 = arith.constant dense<0.000000e+00> : vector<2x128xf32>
      %59 = tpu.matmul %57, %58, %cst_37 {dimension_numbers = #tpu.dot_dimension_numbers<[1], [0], [0], [1], [0, 0, 1, 1], [], []>} : vector<2x128xbf16>, vector<128x128xbf16>, vector<2x128xf32> -> vector<2x128xf32>
      %c0_38 = arith.constant 0 : index
      %c0_39 = arith.constant 0 : index
      %60 = vector.load %arg9[%c0_38, %c0_39] : memref<1x128xf32, #tpu.memory_space<vmem>>, vector<1x128xf32>
      %61 = vector.broadcast %60 : vector<1x128xf32> to vector<2x128xf32>
      %62 = arith.addf %59, %61 : vector<2x128xf32>
      %c0_40 = arith.constant 0 : index
      %c0_41 = arith.constant 0 : index
      %63 = vector.load %arg10[%c0_40, %c0_41] : memref<2x128xf32, #tpu.memory_space<vmem>>, vector<2x128xf32>
      tpu.vector_store %arg10[%c0_40, %c0_41], %62 {strides = array<i32>} : memref<2x128xf32, #tpu.memory_space<vmem>>, vector<2x128xf32>,
    } else {
    }
    return
  }
  func.func @transform_0(%arg0: i32, %arg1: i32) -> (i32, i32, i32) {
    %c0_i32 = arith.constant 0 : i32
    %c0_i32_0 = arith.constant 0 : i32
    return %arg0, %arg1, %c0_i32 : i32, i32, i32
  }
  func.func @transform_1(%arg0: i32, %arg1: i32) -> (i32, i32, i32) {
    %c0_i32 = arith.constant 0 : i32
    %c0_i32_0 = arith.constant 0 : i32
    %c0_i32_1 = arith.constant 0 : i32
    return %arg0, %c0_i32, %c0_i32_0 : i32, i32, i32
  }
  func.func @transform_2(%arg0: i32, %arg1: i32) -> (i32, i32) {
    %c0_i32 = arith.constant 0 : i32
    %c0_i32_0 = arith.constant 0 : i32
    %c0_i32_1 = arith.constant 0 : i32
    return %c0_i32, %c0_i32_0 : i32, i32
  }
  func.func @transform_3(%arg0: i32, %arg1: i32) -> (i32, i32) {
    %c0_i32 = arith.constant 0 : i32
    %c0_i32_0 = arith.constant 0 : i32
    %c0_i32_1 = arith.constant 0 : i32
    return %c0_i32, %c0_i32_0 : i32, i32
  }
  func.func @transform_4(%arg0: i32, %arg1: i32) -> (i32, i32) {
    %c0_i32 = arith.constant 0 : i32
    %c0_i32_0 = arith.constant 0 : i32
    %c0_i32_1 = arith.constant 0 : i32
    return %c0_i32, %c0_i32_0 : i32, i32
  }
  func.func @transform_5(%arg0: i32, %arg1: i32) -> (i32, i32) {
    %c0_i32 = arith.constant 0 : i32
    %c0_i32_0 = arith.constant 0 : i32
    %c0_i32_1 = arith.constant 0 : i32
    return %c0_i32, %c0_i32_0 : i32, i32
  }
  func.func @transform_6(%arg0: i32, %arg1: i32) -> (i32, i32) {
    %c0_i32 = arith.constant 0 : i32
    %c0_i32_0 = arith.constant 0 : i32
    %c0_i32_1 = arith.constant 0 : i32
    return %c0_i32, %c0_i32_0 : i32, i32
  }
  func.func @transform_7(%arg0: i32, %arg1: i32) -> (i32, i32) {
    %c0_i32 = arith.constant 0 : i32
    %c0_i32_0 = arith.constant 0 : i32
    %c0_i32_1 = arith.constant 0 : i32
    return %c0_i32, %c0_i32_0 : i32, i32
  }
  func.func @transform_8(%arg0: i32, %arg1: i32) -> (i32, i32) {
    %c0_i32 = arith.constant 0 : i32
    %c0_i32_0 = arith.constant 0 : i32
    return %arg0, %c0_i32 : i32, i32
  }
}

</mosaic_0001>

<bundles_post_ra>
// kernel: vqa_forward.1
= control target key start
LH: loop header
LB: loop body
LE: loop exit
PB: predicated region body
PF: predicated region fallthrough
CT: control target
= control target key end

     0   :  { %s1183_s0 = inlined_call_operand.vmem [shape: bf16[2,4,256], index: 0, kind: input, shape index: {}]   ;;  %s1184_s1 = inlined_call_operand.vmem [shape: bf16[2,8,128], index: 1, kind: input, shape index: {}]   ;;  %s1185_s2 = inlined_call_operand.vmem [shape: bf16[256,128], index: 2, kind: input, shape index: {}]   ;;  %s1186_s3 = inlined_call_operand.vmem [shape: bf16[128,128], index: 3, kind: input, shape index: {}]   ;;  %s1187_s4 = inlined_call_operand.vmem [shape: bf16[128,128], index: 4, kind: input, shape index: {}]   ;;  %s1188_s5 = inlined_call_operand.vmem [shape: f32[1,128], index: 5, kind: input, shape index: {}]   ;;  %s1189_s6 = inlined_call_operand.vmem [shape: bf16[128,128], index: 6, kind: input, shape index: {}]   ;;  %s1190_s7 = inlined_call_operand.vmem [shape: f32[1,128], index: 7, kind: input, shape index: {}]   ;;  %s1191_s8 = inlined_call_operand.hbm [shape: f32[2,128], index: 8, kind: output, shape index: {}]  }
   0x1   :  { %v883_v0 = vld [vmem:[%s1185_s2 + $0x40] sm:$0xff]   ;;  %v885_v2 = vld [vmem:[%s1185_s2 + $0x48] sm:$0xff]   ;;  %v887_v4 = vld [vmem:[%s1185_s2 + $0x50] sm:$0xff]  }
   0x2   :  { %v884_v1 = vld [vmem:[%s1185_s2] sm:$0xff]   ;;  %749 = vmatprep.subr.bf16.mxu0 %v883_v0  ;;  %771 = vmatprep.subr.bf16.mxu1 %v883_v0  ;;  %v886_v3 = vld [vmem:[%s1185_s2 + $0x8] sm:$0xff]   ;;  %v888_v5 = vld [vmem:[%s1185_s2 + $0x10] sm:$0xff]  }
   0x3   :  { %750 = vmatpush3.bf16.msra.mxu0 %v884_v1  ;;  %772 = vmatpush3.bf16.msra.mxu1 %v884_v1  ;;  %v889_v6 = vld [vmem:[%s1185_s2 + $0x58] sm:$0xff]   ;;  %v891_v8 = vld [vmem:[%s1185_s2 + $0x60] sm:$0xff]   ;;  %v893_v10 = vld [vmem:[%s1185_s2 + $0x68] sm:$0xff]  }
   0x4   :  { %751 = vmatprep.subr.bf16.mxu0 %v885_v2  ;;  %773 = vmatprep.subr.bf16.mxu1 %v885_v2  ;;  %v890_v7 = vld [vmem:[%s1185_s2 + $0x18] sm:$0xff]   ;;  %v892_v9 = vld [vmem:[%s1185_s2 + $0x20] sm:$0xff]   ;;  %v894_v12 = vld [vmem:[%s1185_s2 + $0x28] sm:$0xff]  }
   0x5   :  { %v701_v11 = vld.sshfl [vmem:[%s1183_s0] sm:$0x33 pattern:$0x76325410]  ;;  %v895_v15 = vld [vmem:[%s1185_s2 + $0x70] sm:$0xff]   ;;  %v897_v18 = vld [vmem:[%s1185_s2 + $0x78] sm:$0xff]  }
   0x6   :  { %v78_v13 = vcombine.high %v701_v11, %v701_v11  ;;  %v718_v14 = vld.sshfl [vmem:[%s1183_s0 + $0x4] sm:$0x33 pattern:$0x76325410]  ;;  %v896_v17 = vld [vmem:[%s1185_s2 + $0x30] sm:$0xff]   ;;  %v898_v19 = vld [vmem:[%s1185_s2 + $0x38] sm:$0xff]  }
   0x7   :  { %752 = vmatpush3.bf16.msra.mxu0 %v886_v3  ;;  %774 = vmatpush3.bf16.msra.mxu1 %v886_v3  ;;  %v225_v16 = vcombine.high %v718_v14, %v718_v14 }
   0x8   :  { %753 = vmatprep.subr.bf16.mxu0 %v887_v4  ;;  %775 = vmatprep.subr.bf16.mxu1 %v887_v4 }
   0x9   :  { %209 = vmatprep.mubr.bf16.mxu0 %v78_v13  ;;  %260 = vmatprep.mubr.bf16.mxu1 %v225_v16 }
   0xb   :  { %754 = vmatpush3.bf16.msra.mxu0 %v888_v5  ;;  %776 = vmatpush3.bf16.msra.mxu1 %v888_v5 }
   0xc   :  { %755 = vmatprep.subr.bf16.mxu0 %v889_v6  ;;  %777 = vmatprep.subr.bf16.mxu1 %v889_v6 }
   0xf   :  { %756 = vmatpush3.bf16.msra.mxu0 %v890_v7  ;;  %778 = vmatpush3.bf16.msra.mxu1 %v890_v7 }
  0x10   :  { %757 = vmatprep.subr.bf16.mxu0 %v891_v8  ;;  %779 = vmatprep.subr.bf16.mxu1 %v891_v8 }
  0x13   :  { %758 = vmatpush3.bf16.msra.mxu0 %v892_v9  ;;  %780 = vmatpush3.bf16.msra.mxu1 %v892_v9 }
  0x14   :  { %759 = vmatprep.subr.bf16.mxu0 %v893_v10  ;;  %781 = vmatprep.subr.bf16.mxu1 %v893_v10 }
  0x17   :  { %760 = vmatpush3.bf16.msra.mxu0 %v894_v12  ;;  %782 = vmatpush3.bf16.msra.mxu1 %v894_v12 }
  0x18   :  { %761 = vmatprep.subr.bf16.mxu0 %v895_v15  ;;  %783 = vmatprep.subr.bf16.mxu1 %v895_v15 }
  0x1b   :  { %762 = vmatpush3.bf16.msra.mxu0 %v896_v17  ;;  %784 = vmatpush3.bf16.msra.mxu1 %v896_v17 }
  0x1c   :  { %763 = vmatprep.subr.bf16.mxu0 %v897_v18  ;;  %785 = vmatprep.subr.bf16.mxu1 %v897_v18 }
  0x1f   :  { %764 = vmatpush3.bf16.msra.mxu0 %v898_v19  ;;  %786 = vmatpush3.bf16.msra.mxu1 %v898_v19 }
  0x20   :  { %13 = vsyncpa [#allocation4], 0  ;;  %v746_v20 = vld [vmem:[%s1184_s1] sm:$0xff]   ;;  %v955_v34 = vmov 0.0   ;;  %v901_v36 = vld [vmem:[%s1187_s4 + $0x8] sm:$0xff]   ;;  %vm956_vm0 = vmmov 0  }
  0x21   :  { %v747_v21 = vunpack.c.l.bf16 %v746_v20  ;;  %v748_v22 = vunpack.c.h.bf16 %v746_v20  ;;  %v899_v33 = vld [vmem:[%s1187_s4] sm:$0xff]   ;;  %820 = vmatprep.subr.bf16.mxu0 %v955_v34  ;;  %35 = vst [vmem:[#allocation2] sm:$0x3] %v955_v34  ;;  %840 = vmatprep.subr.bf16.mxu1 %v955_v34  ;;  %v902_v38 = vld [vmem:[%s1186_s3 + $0x8] sm:$0xff]   ;;  %v903_v40 = vld [vmem:[%s1187_s4 + $0x10] sm:$0xff]   ;;  %vm304_vm1 = vcmask 1041409  }
  0x22   :  { %210 = vmatmul.mubr.bf16.vlgmr.msra.gmra.mrb[0].mxu0 %v701_v11  ;;  %261 = vmatmul.mubr.bf16.vlgmr.msra.gmra.mrb[0].mxu1 %v718_v14  ;;  %v900_v35 = vld [vmem:[%s1186_s3] sm:$0xff]   ;;  %v904_v44 = vld [vmem:[%s1186_s3 + $0x10] sm:$0xff]   ;;  %v905_v46 = vld [vmem:[%s1187_s4 + $0x18] sm:$0xff]   ;;  %vm287_vm2 = vcmask 1043456   ;;  %s957_s2 = smov [#allocation3]  }
  0x23   :  { %v316_v23 = vmul.f32 %v747_v21, %v747_v21  ;;  %v317_v24 = vmul.f32 %v748_v22, %v748_v22  ;;  %821 = vmatpush3.bf16.msra.mxu0 %v899_v33  ;;  %841 = vmatpush3.bf16.msra.mxu1 %v900_v35  ;;  %v906_v50 = vld [vmem:[%s1186_s3 + $0x18] sm:$0xff]   ;;  %v907_v52 = vld [vmem:[%s1187_s4 + $0x20] sm:$0xff]   ;;  %v909_v58 = vld [vmem:[%s1187_s4 + $0x28] sm:$0xff]  }
  0x24   :  { %822 = vmatprep.subr.bf16.mxu0 %v955_v34  ;;  %842 = vmatprep.subr.bf16.mxu1 %v955_v34  ;;  %v908_v56 = vld [vmem:[%s1186_s3 + $0x20] sm:$0xff]   ;;  %v910_v60 = vld [vmem:[%s1186_s3 + $0x28] sm:$0xff]   ;;  %v911_v62 = vld [vmem:[%s1187_s4 + $0x30] sm:$0xff]  }
  0x25   :  { %v318_v25 = vmul.f32 %v747_v21, %v316_v23  ;;  %v319_v26 = vmul.f32 %v748_v22, %v317_v24  ;;  %836 = vmatprep.mubr.msk.bf16.mxu0 %vm956_vm0, %v955_v34  ;;  %856 = vmatprep.mubr.msk.bf16.mxu1 %vm956_vm0, %v955_v34  ;;  %v912_v2 = vld [vmem:[%s1186_s3 + $0x30] sm:$0xff]   ;;  %v913_v4 = vld [vmem:[%s1187_s4 + $0x38] sm:$0xff]   ;;  %v915_v12 = vld [vmem:[%s1189_s6] sm:$0xff]  }
  0x26   :  { %v914_v9 = vld [vmem:[%s1186_s3 + $0x38] sm:$0xff]   ;;  %v916_v13 = vld [vmem:[%s1189_s6 + $0x8] sm:$0xff]   ;;  %v917_v14 = vld [vmem:[%s1189_s6 + $0x10] sm:$0xff]  }
  0x27   :  { %v320_v27 = vmul.f32 0.044715, %v318_v25  ;;  %v321_v28 = vmul.f32 0.044715, %v319_v26  ;;  %823 = vmatpush3.bf16.msra.mxu0 %v901_v36  ;;  %843 = vmatpush3.bf16.msra.mxu1 %v902_v38  ;;  %v918_v15 = vld [vmem:[%s1189_s6 + $0x18] sm:$0xff]   ;;  %v919_v16 = vld [vmem:[%s1189_s6 + $0x20] sm:$0xff]  }
  0x28   :  { %824 = vmatprep.subr.bf16.mxu0 %v955_v34  ;;  %844 = vmatprep.subr.bf16.mxu1 %v955_v34  ;;  %v920_v38 = vld [vmem:[%s1189_s6 + $0x28] sm:$0xff]  }
  0x29   :  { %v322_v29 = vadd.f32 %v747_v21, %v320_v27  ;;  %v323_v30 = vadd.f32 %v748_v22, %v321_v28 }
  0x2b   :  { %v324_v31 = vmul.f32 0.7978846, %v322_v29  ;;  %v325_v32 = vmul.f32 0.7978846, %v323_v30  ;;  %825 = vmatpush3.bf16.msra.mxu0 %v903_v40  ;;  %845 = vmatpush3.bf16.msra.mxu1 %v904_v44 }
  0x2c   :  { %826 = vmatprep.subr.bf16.mxu0 %v955_v34  ;;  %846 = vmatprep.subr.bf16.mxu1 %v955_v34 }
  0x2d   :  { %923 = vtanh.f32 %v324_v31 }
  0x2e   :  { %925 = vtanh.f32 %v325_v32 }
  0x2f   :  { %827 = vmatpush3.bf16.msra.mxu0 %v905_v46  ;;  %847 = vmatpush3.bf16.msra.mxu1 %v906_v50 }
  0x30   :  { %828 = vmatprep.subr.bf16.mxu0 %v955_v34  ;;  %848 = vmatprep.subr.bf16.mxu1 %v955_v34 }
  0x33   :  { %829 = vmatpush3.bf16.msra.mxu0 %v907_v52  ;;  %849 = vmatpush3.bf16.msra.mxu1 %v908_v56 }
  0x34   :  { %830 = vmatprep.subr.bf16.mxu0 %v955_v34  ;;  %850 = vmatprep.subr.bf16.mxu1 %v955_v34 }
  0x37   :  { %v924_v37 = vpop.eup %923  ;;  %831 = vmatpush3.bf16.msra.mxu0 %v909_v58  ;;  %851 = vmatpush3.bf16.msra.mxu1 %v910_v60 }
  0x38   :  { %v926_v39 = vpop.eup %925  ;;  %v328_v41 = vadd.f32 1.0, %v924_v37  ;;  %832 = vmatprep.subr.bf16.mxu0 %v955_v34  ;;  %852 = vmatprep.subr.bf16.mxu1 %v955_v34 }
  0x39   :  { %v329_v42 = vadd.f32 1.0, %v926_v39 }
  0x3a   :  { %v330_v43 = vmul.f32 0.5, %v328_v41 }
  0x3b   :  { %v331_v45 = vmul.f32 0.5, %v329_v42  ;;  %833 = vmatpush3.bf16.msra.mxu0 %v911_v62  ;;  %853 = vmatpush3.bf16.msra.mxu1 %v912_v2 }
  0x3c   :  { %v332_v47 = vmul.f32 %v747_v21, %v330_v43  ;;  %834 = vmatprep.subr.bf16.mxu0 %v955_v34  ;;  %854 = vmatprep.subr.bf16.mxu1 %v955_v34 }
  0x3d   :  { %v333_v48 = vmul.f32 %v748_v22, %v331_v45 }
  0x3e   :  { %v334_v49 = vrot.slane %v332_v47, 4 }
  0x3f   :  { %v340_v51 = vrot.slane %v333_v48, 4  ;;  %835 = vmatpush3.bf16.msra.mxu0 %v913_v4  ;;  %855 = vmatpush3.bf16.msra.mxu1 %v914_v9  ;;  %v735_v9 = vld [vmem:[%s1188_s5] ss:$0 sm:$0xff] }
  0x40   :  { %v335_v53 = vadd.f32 %v334_v49, %v332_v47  ;;  %860 = vmatprep.subr.bf16.mxu0 %v955_v34 }
  0x41   :  { %v341_v54 = vadd.f32 %v340_v51, %v333_v48 }
  0x42   :  { %v336_v55 = vrot.slane %v335_v53, 2 }
  0x43   :  { %v342_v57 = vrot.slane %v341_v54, 2 }
  0x44   :  { %v337_v59 = vadd.f32 %v336_v55, %v335_v53 }
  0x45   :  { %v343_v61 = vadd.f32 %v342_v57, %v341_v54 }
  0x46   :  { %v338_v63 = vrot.slane %v337_v59, 1 }
  0x47   :  { %v344_v0 = vrot.slane %v343_v61, 1 }
  0x48   :  { %v339_v1 = vadd.f32 %v338_v63, %v337_v59 }
  0x49   :  { %v345_v3 = vadd.f32 %v344_v0, %v343_v61  ;;  %v286_v61 = vld [vmem:[#allocation2] sm:$0x3] }
  0x4a   :  { %v364_v5 = vpack.c.bf16 %v339_v1, %v339_v1 }
  0x4b   :  { %v365_v6 = vpack.c.bf16 %v345_v3, %v345_v3 }
  0x4c   :  { %v384_v7 = vunpack.c.l.b16 %v364_v5  ;;  %v921_v5 = vld [vmem:[%s1189_s6 + $0x30] sm:$0xff]  }
  0x4d   :  { %v385_v8 = vunpack.c.l.b16 %v365_v6 }
  0x4f   :  { %v386_v10 = vsel %vm304_vm1, %v385_v8, %v384_v7  ;;  %v922_v7 = vld [vmem:[%s1189_s6 + $0x38] sm:$0xff]   ;;  %s693_s6 = sshll.u32 %s957_s2, 4  ;;  %s694_s6 = int_to_ptr.vmem [resolvable:$true] %s693_s6 }
  0x50   :  { %v387_v11 = vpack.c.b16 %v386_v10, %v386_v10  ;;  %s931_s5 = scalar_lea.vmem %s694_s6, 32  ;;  %p936_p1 = scmp.lt.s32.totalorder %s694_s6, %s694_s6 }
  0x51   :  { %p932_p0 = scmp.ne.s32.totalorder %s694_s6, %s931_s5  ;;  %p937_p2 = scmp.lt.s32.totalorder %s931_s5, %s931_s5 }
  0x52   :  { %837 = vmatmul.mubr.bf16.vlgmr.msra.gmra.mrb[4].mxu0 %v387_v11 }
  0x53   :  { %876 = vmatprep.mubr.msk.bf16.mxu0 %vm956_vm0, %v955_v34  ;;  %861 = vmatpush3.bf16.msra.mxu0 %v915_v12  ;;  %p938_p3 = por %p937_p2, %p936_p1 }
  0x54   :  { %862 = vmatprep.subr.bf16.mxu0 %v955_v34 }
  0x55   :  { %p939_p4 = pnand %p938_p3, %p932_p0 }
  0x57   :  { %863 = vmatpush3.bf16.msra.mxu0 %v916_v13 }
  0x58   :  { %864 = vmatprep.subr.bf16.mxu0 %v955_v34 }
  0x5b   :  { %865 = vmatpush3.bf16.msra.mxu0 %v917_v14 }
  0x5c   :  { %866 = vmatprep.subr.bf16.mxu0 %v955_v34 }
  0x5f   :  { %867 = vmatpush3.bf16.msra.mxu0 %v918_v15 }
  0x60   :  { %868 = vmatprep.subr.bf16.mxu0 %v955_v34 }
  0x63   :  { %869 = vmatpush3.bf16.msra.mxu0 %v919_v16 }
  0x64   :  { %870 = vmatprep.subr.bf16.mxu0 %v955_v34 }
  0x67   :  { %871 = vmatpush3.bf16.msra.mxu0 %v920_v38 }
  0x68   :  { %872 = vmatprep.subr.bf16.mxu0 %v955_v34 }
  0x6b   :  { %873 = vmatpush3.bf16.msra.mxu0 %v921_v5 }
  0x6c   :  { %874 = vmatprep.subr.bf16.mxu0 %v955_v34  ;;  %v736_v34 = vld [vmem:[%s1190_s7] ss:$0 sm:$0xff] }
  0x6f   :  { %875 = vmatpush3.bf16.msra.mxu0 %v922_v7 }
  0xf5   :  { %v765_v17 = vpop.f32.mrb[0].mxu0  ;;  %v787_v18 = vpop.f32.mrb[0].mxu1 }
  0xf6   :  { %v766_v19 = vpop.f32.mrb[1].mxu0  ;;  %v788_v20 = vpop.f32.mrb[1].mxu1 }
  0xf7   :  { %v767_v21 = vadd.f32 %v766_v19, %v765_v17  ;;  %v789_v22 = vadd.f32 %v788_v20, %v787_v18  ;;  %v768_v23 = vpop.f32.mrb[2].mxu0  ;;  %v790_v24 = vpop.f32.mrb[2].mxu1 }
  0xf8   :  { %v769_v25 = vpop.f32.mrb[3].mxu0  ;;  %v791_v26 = vpop.f32.mrb[3].mxu1 }
  0xf9   :  { %v268_v27 = vmul.f32 %v767_v21, %v767_v21  ;;  %v269_v28 = vmul.f32 %v789_v22, %v789_v22 }
  0xfb   :  { %v270_v29 = vmul.f32 %v767_v21, %v268_v27  ;;  %v271_v30 = vmul.f32 %v789_v22, %v269_v28 }
  0xfd   :  { %v272_v31 = vmul.f32 0.044715, %v270_v29  ;;  %v273_v32 = vmul.f32 0.044715, %v271_v30 }
  0xff   :  { %v274_v33 = vadd.f32 %v767_v21, %v272_v31  ;;  %v275_v35 = vadd.f32 %v789_v22, %v273_v32 }
 0x101   :  { %v276_v36 = vmul.f32 0.7978846, %v274_v33  ;;  %v277_v37 = vmul.f32 0.7978846, %v275_v35 }
 0x103   :  { %927 = vtanh.f32 %v276_v36 }
 0x104   :  { %929 = vtanh.f32 %v277_v37 }
 0x10d   :  { %v928_v39 = vpop.eup %927 }
 0x10e   :  { %v930_v40 = vpop.eup %929  ;;  %v280_v41 = vadd.f32 1.0, %v928_v39 }
 0x10f   :  { %v281_v42 = vadd.f32 1.0, %v930_v40 }
 0x110   :  { %v282_v43 = vmul.f32 0.5, %v280_v41 }
 0x111   :  { %v283_v44 = vmul.f32 0.5, %v281_v42 }
 0x112   :  { %v284_v45 = vmul.f32 %v767_v21, %v282_v43 }
 0x113   :  { %v285_v46 = vmul.f32 %v789_v22, %v283_v44 }
 0x114   :  { %v288_v47 = vsel %vm287_vm2, %v284_v45, 0.0 }
 0x115   :  { %v289_v48 = vrot.slane %v288_v47, 4  ;;  %v295_v49 = vsel %vm287_vm2, %v285_v46, 0.0 }
 0x116   :  { %v296_v50 = vrot.slane %v295_v49, 4 }
 0x117   :  { %v290_v51 = vadd.f32 %v289_v48, %v288_v47 }
 0x118   :  { %v297_v52 = vadd.f32 %v296_v50, %v295_v49 }
 0x119   :  { %v291_v53 = vrot.slane %v290_v51, 2 }
 0x11a   :  { %v298_v54 = vrot.slane %v297_v52, 2 }
 0x11b   :  { %v292_v55 = vadd.f32 %v291_v53, %v290_v51 }
 0x11c   :  { %v299_v56 = vadd.f32 %v298_v54, %v297_v52 }
 0x11d   :  { %v293_v57 = vrot.slane %v292_v55, 1 }
 0x11e   :  { %v300_v58 = vrot.slane %v299_v56, 1 }
 0x11f   :  { %v294_v59 = vadd.f32 %v293_v57, %v292_v55 }
 0x120   :  { %v301_v60 = vadd.f32 %v300_v58, %v299_v56 }
 0x122   :  { %v305_v62 = vsel %vm304_vm1, %v301_v60, %v294_v59 }
 0x123   :  { %v307_v63 = vadd.f32 %v305_v62, %v286_v61 }
 0x125   :  { %308 = vst [vmem:[#allocation2] sm:$0x3] %v307_v63  ;;  %v471_v2 = vpop.f32.mrb[4].mxu0 }
 0x126   :  { %v838_v3 = vpop.f32.mrb[5].mxu0 }
 0x127   :  { %v474_v4 = vpop.f32.mrb[6].mxu0 }
 0x128   :  { %v839_v6 = vpop.f32.mrb[7].mxu0 }
 0x12c   :  { %v346_v0 = vld [vmem:[#allocation2] sm:$0x3] }
 0x12d   :  { %v347_v1 = vpack.c.bf16 %v346_v0, %v346_v0 }
 0x12f   :  { %857 = vmatmul.mubr.bf16.vlgmr.msra.gmra.mrb[4].mxu1 %v347_v1 }
 0x202   :  { %v559_v8 = vpop.f32.mrb[4].mxu1 }
 0x203   :  { %v560_v10 = vadd.f32 %v559_v8, %v471_v2  ;;  %v858_v11 = vpop.f32.mrb[5].mxu1 }
 0x204   :  { %v562_v12 = vpop.f32.mrb[6].mxu1 }
 0x205   :  { %v572_v13 = vadd.f32 %v735_v9, %v560_v10  ;;  %v859_v14 = vpop.f32.mrb[7].mxu1 }
 0x207   :  { %v573_v15 = vmax.f32 %v572_v13, 0.0 }
 0x209   :  { %v574_v16 = vpack.c.bf16 %v573_v15, %v573_v15 }
 0x20b   :  { %877 = vmatmul.mubr.bf16.vlgmr.msra.gmra.mrb[8].mxu0 %v574_v16 }
 0x2de   :  { %v680_v17 = vpop.f32.mrb[8].mxu0 }
 0x2df   :  { %v681_v18 = vadd.f32 %v736_v34, %v680_v17  ;;  %v878_v19 = vpop.f32.mrb[9].mxu0 }
 0x2e0   :  { %v683_v20 = vpop.f32.mrb[10].mxu0 }
 0x2e1   :  { %686 = vst [vmem:[#allocation3] sm:$0x3] %v681_v18  ;;  %v879_v21 = vpop.f32.mrb[11].mxu0 }
 0x2e2   :  { %942 = shalt.err (!%p939_p4)
}
 0x2e3   :  { %s943_s7 = scalar_lea.hbm %s1191_s8, 32 }
 0x2e4   :  { %p944_p5 = scmp.ne.s32.totalorder %s1191_s8, %s943_s7  ;;  %p947_p6 = scmp.lt.u32.totalorder %s943_s7, %s1191_s8 }
 0x2e6   :  { %p949_p7 = pnand %p947_p6, %p944_p5 }
 0x2e8   :  { %952 = shalt.err (!%p949_p7)
}
 0x2e9   :  { %696 = dma.vmem_to_hbm [thread:$0]  %s694_s6, 32, %s1191_s8, [#allocation4]  }
 0x2ea   :  { %953 = dma.done.wait [#allocation4], 32  }
 0x2eb   :  { %954 = vsyncadd [#allocation4], 4294967264 }
 0x2ec   :  { %700 = vsyncpa [#allocation4], 1 }

</bundles_post_ra>
